<compile_context>
chip_gen: v7x
topology: tpu7x:2x2x1
jax: 0.10.0
libtpu: 0.0.40
codegen_flags: <defaults>
</compile_context>

<pallas_src>
import jax
import jax.numpy as jnp
from jax import lax
from jax.experimental import pallas as pl
from jax.experimental.pallas import tpu as pltpu

EPS = 1e-5      # nn.InstanceNorm2d default eps
K = 3           # kernel size
STRIDE = 2
PAD = 1


def _conv_instancenorm_kernel(x_ref, w_ref, o_ref, xp_ref):
    """Fused Conv2d(Cin->Cout, k=3, s=2, p=1) + InstanceNorm2d (affine=False).

    x_ref : (Cin, H, W)        input sample (batch dim squeezed in wrapper)
    w_ref : (Cout, Cin*K*K)    conv weight, channel-major tap order (cin,kh,kw)
    o_ref : (Cout, P)          instance-normalized conv output, P = Hout*Wout
    xp_ref: (Cin, H+2, W+2)    VMEM scratch holding the zero-padded input
    """
    Cin, H, W = x_ref.shape
    Cout, CKK = w_ref.shape
    Hout = (H + 2 * PAD - K) // STRIDE + 1
    Wout = (W + 2 * PAD - K) // STRIDE + 1

    # --- in-kernel zero padding (replaces the separate XLA im2col op) -------
    xp_ref[...] = jnp.zeros_like(xp_ref)
    xp_ref[:, PAD:PAD + H, PAD:PAD + W] = x_ref[...]

    w = w_ref[...]                                           # (Cout, CKK)

    # --- conv: per output position gather the Cin*K*K window as one 18-lane
    # row, then contract against all output channels with a VPU broadcast-FMA
    # + lane reduction. Static Python loops -> straight-line code; MXU skipped
    # on purpose (4x18x4 is pure push/drain latency at <2% utilization).
    cols = []
    for oh in range(Hout):
        for ow in range(Wout):
            taps = [
                xp_ref[cin, pl.ds(STRIDE * oh + kh, 1), pl.ds(STRIDE * ow, K)]
                for cin in range(Cin)
                for kh in range(K)
            ]                                                # Cin*K x (1, K)
            row = jnp.concatenate(taps, axis=1)              # (1, CKK) lanes
            # conv[:, p] = sum_k w[:, k] * row[0, k]   (lane reduce, no bias:
            # a per-channel bias is cancelled by InstanceNorm's mean subtract)
            cols.append(jnp.sum(w * row, axis=1, keepdims=True))   # (Cout, 1)
    conv = jnp.concatenate(cols, axis=1)                     # (Cout, P)

    # --- InstanceNorm2d: per-channel stats over spatial positions,
    # biased variance, eps = 1e-5 (PyTorch defaults), rsqrt on the EUP.
    mu = jnp.mean(conv, axis=1, keepdims=True)               # (Cout, 1)
    ctr = conv - mu
    var = jnp.mean(ctr * ctr, axis=1, keepdims=True)         # (Cout, 1)
    o_ref[...] = ctr * lax.rsqrt(var + EPS)


def _net_forward_impl(x, w):
    """x: (1, Cin, H, W) NCHW float32.  Returns InstanceNorm(Conv2d(x)) NCHW.

    The PyTorch module also runs BatchNorm/LayerNorm/GroupNorm branches (and
    prints them) but forward() returns only the InstanceNorm output, so only
    that branch is computed.  The conv bias is omitted on purpose: InstanceNorm
    cancels a per-channel bias exactly (verified against a biased reference).
    """
    N, Cin, H, W = x.shape
    Cout, Cin_w, Kh, Kw = w.shape
    assert Cin_w == Cin and Kh == K and Kw == K
    # LayerNorm([1, 4, 2, 2]) inside the original module pins the batch to 1.
    assert N == 1, "Net's LayerNorm([1,4,2,2]) requires batch size N == 1"
    Hout = (H + 2 * PAD - K) // STRIDE + 1
    Wout = (W + 2 * PAD - K) // STRIDE + 1
    P = Hout * Wout
    CKK = Cin * K * K

    x3 = x.reshape(Cin, H, W)        # free metadata reshape under jit
    w2 = w.reshape(Cout, CKK)        # channel-major tap order matches kernel

    out = pl.pallas_call(
        _conv_instancenorm_kernel,
        out_shape=jax.ShapeDtypeStruct((Cout, P), jnp.float32),
        in_specs=[
            pl.BlockSpec((Cin, H, W), lambda: (0, 0, 0)),
            pl.BlockSpec((Cout, CKK), lambda: (0, 0)),
        ],
        out_specs=pl.BlockSpec((Cout, P), lambda: (0, 0)),
        scratch_shapes=[
            pltpu.VMEM((Cin, H + 2 * PAD, W + 2 * PAD), jnp.float32),
        ],
    )(x3, w2)

    # Channel-major (Cout, P) slab -> NCHW is a pure reshape (no transpose).
    return out.reshape(N, Cout, Hout, Wout)


# Single jitted executable: reshapes + pallas custom call, one dispatch.
net_forward = jax.jit(_net_forward_impl)


if __name__ == "__main__":
    key = jax.random.PRNGKey(0)
    kx, kw, kb = jax.random.split(key, 3)

    # Conv2d(2->4, k=3, s=2, p=1) + LayerNorm([1, 4, 2, 2]) in the module imply
    # input (1, 2, 4, 4) and conv output (1, 4, 2, 2).
    x = jax.random.normal(kx, (1, 2, 4, 4), dtype=jnp.float32)
    w = jax.random.normal(kw, (4, 2, 3, 3), dtype=jnp.float32) * 0.1
    b = jax.random.normal(kb, (4,), dtype=jnp.float32) * 0.1  # used only in ref

    out = jax.block_until_ready(net_forward(x, w))
    assert out.shape == (1, 4, 2, 2)

    # Reference: XLA conv WITH bias + instance norm.  The kernel drops the bias
    # because InstanceNorm cancels it; matching the biased reference proves it.
    conv_ref = lax.conv_general_dilated(
        x, w, window_strides=(STRIDE, STRIDE), padding=((PAD, PAD), (PAD, PAD)),
        dimension_numbers=("NCHW", "OIHW", "NCHW")) + b.reshape(1, 4, 1, 1)
    mu = conv_ref.mean(axis=(2, 3), keepdims=True)
    var = ((conv_ref - mu) ** 2).mean(axis=(2, 3), keepdims=True)
    ref = (conv_ref - mu) * lax.rsqrt(var + EPS)
    err = float(jnp.max(jnp.abs(out - ref)))
    assert err < 1e-4, f"mismatch vs reference, max abs err = {err}"

    print("KERNEL_OK")
</pallas_src>

<mosaic_0001>
module attributes {stable_mosaic.version = 11 : i64} {
  func.func @_conv_instancenorm_kernel(%arg0: memref<2x4x4xf32, #tpu.memory_space<vmem>>, %arg1: memref<4x18xf32, #tpu.memory_space<vmem>>, %arg2: memref<4x4xf32, #tpu.memory_space<vmem>>, %arg3: memref<2x6x6xf32, #tpu.memory_space<vmem>>) attributes {dimension_semantics = [], scalar_prefetch = 0 : i64, scratch_operands = 1 : i64, tpu.core_type = #tpu.core_type<tc>} {
    %cst = arith.constant 0.000000e+00 : f32
    %0 = vector.broadcast %cst : f32 to vector<2x6x6xf32>
    %c0 = arith.constant 0 : index
    %c0_0 = arith.constant 0 : index
    %c0_1 = arith.constant 0 : index
    %1 = vector.load %arg3[%c0, %c0_0, %c0_1] : memref<2x6x6xf32, #tpu.memory_space<vmem>>, vector<2x6x6xf32>
    tpu.vector_store %arg3[%c0, %c0_0, %c0_1], %0 {strides = array<i32>} : memref<2x6x6xf32, #tpu.memory_space<vmem>>, vector<2x6x6xf32>,
    %c0_2 = arith.constant 0 : index
    %c0_3 = arith.constant 0 : index
    %c0_4 = arith.constant 0 : index
    %2 = vector.load %arg0[%c0_2, %c0_3, %c0_4] : memref<2x4x4xf32, #tpu.memory_space<vmem>>, vector<2x4x4xf32>
    %c0_5 = arith.constant 0 : index
    %c1 = arith.constant 1 : index
    %c1_6 = arith.constant 1 : index
    %3 = vector.load %arg3[%c0_5, %c1, %c1_6] : memref<2x6x6xf32, #tpu.memory_space<vmem>>, vector<2x4x4xf32>
    tpu.vector_store %arg3[%c0_5, %c1, %c1_6], %2 {strides = array<i32>} : memref<2x6x6xf32, #tpu.memory_space<vmem>>, vector<2x4x4xf32>,
    %c0_7 = arith.constant 0 : index
    %c0_8 = arith.constant 0 : index
    %4 = vector.load %arg1[%c0_7, %c0_8] : memref<4x18xf32, #tpu.memory_space<vmem>>, vector<4x18xf32>
    %c0_9 = arith.constant 0 : index
    %c0_10 = arith.constant 0 : index
    %c0_11 = arith.constant 0 : index
    %5 = vector.load %arg3[%c0_9, %c0_10, %c0_11] : memref<2x6x6xf32, #tpu.memory_space<vmem>>, vector<1x1x3xf32>
    %6 = vector.shape_cast %5 : vector<1x1x3xf32> to vector<1x3xf32>
    %c0_12 = arith.constant 0 : index
    %c1_13 = arith.constant 1 : index
    %c0_14 = arith.constant 0 : index
    %7 = vector.load %arg3[%c0_12, %c1_13, %c0_14] : memref<2x6x6xf32, #tpu.memory_space<vmem>>, vector<1x1x3xf32>
    %8 = vector.shape_cast %7 : vector<1x1x3xf32> to vector<1x3xf32>
    %c0_15 = arith.constant 0 : index
    %c2 = arith.constant 2 : index
    %c0_16 = arith.constant 0 : index
    %9 = vector.load %arg3[%c0_15, %c2, %c0_16] : memref<2x6x6xf32, #tpu.memory_space<vmem>>, vector<1x1x3xf32>
    %10 = vector.shape_cast %9 : vector<1x1x3xf32> to vector<1x3xf32>
    %c1_17 = arith.constant 1 : index
    %c0_18 = arith.constant 0 : index
    %c0_19 = arith.constant 0 : index
    %11 = vector.load %arg3[%c1_17, %c0_18, %c0_19] : memref<2x6x6xf32, #tpu.memory_space<vmem>>, vector<1x1x3xf32>
    %12 = vector.shape_cast %11 : vector<1x1x3xf32> to vector<1x3xf32>
    %c1_20 = arith.constant 1 : index
    %c1_21 = arith.constant 1 : index
    %c0_22 = arith.constant 0 : index
    %13 = vector.load %arg3[%c1_20, %c1_21, %c0_22] : memref<2x6x6xf32, #tpu.memory_space<vmem>>, vector<1x1x3xf32>
    %14 = vector.shape_cast %13 : vector<1x1x3xf32> to vector<1x3xf32>
    %c1_23 = arith.constant 1 : index
    %c2_24 = arith.constant 2 : index
    %c0_25 = arith.constant 0 : index
    %15 = vector.load %arg3[%c1_23, %c2_24, %c0_25] : memref<2x6x6xf32, #tpu.memory_space<vmem>>, vector<1x1x3xf32>
    %16 = vector.shape_cast %15 : vector<1x1x3xf32> to vector<1x3xf32>
    %17 = tpu.concatenate %6, %8, %10, %12, %14, %16 in 1 : vector<1x3xf32>, vector<1x3xf32>, vector<1x3xf32>, vector<1x3xf32>, vector<1x3xf32>, vector<1x3xf32> -> vector<1x18xf32>
    %18 = vector.broadcast %17 : vector<1x18xf32> to vector<4x18xf32>
    %19 = arith.mulf %4, %18 : vector<4x18xf32>
    %cst_26 = arith.constant dense<0.000000e+00> : vector<4xf32>
    %20 = vector.multi_reduction <add>, %19, %cst_26 [1] : vector<4x18xf32> to vector<4xf32>
    %21 = vector.shape_cast %20 : vector<4xf32> to vector<4x1xf32>
    %c0_27 = arith.constant 0 : index
    %c0_28 = arith.constant 0 : index
    %c2_29 = arith.constant 2 : index
    %22 = vector.load %arg3[%c0_27, %c0_28, %c2_29] : memref<2x6x6xf32, #tpu.memory_space<vmem>>, vector<1x1x3xf32>
    %23 = vector.shape_cast %22 : vector<1x1x3xf32> to vector<1x3xf32>
    %c0_30 = arith.constant 0 : index
    %c1_31 = arith.constant 1 : index
    %c2_32 = arith.constant 2 : index
    %24 = vector.load %arg3[%c0_30, %c1_31, %c2_32] : memref<2x6x6xf32, #tpu.memory_space<vmem>>, vector<1x1x3xf32>
    %25 = vector.shape_cast %24 : vector<1x1x3xf32> to vector<1x3xf32>
    %c0_33 = arith.constant 0 : index
    %c2_34 = arith.constant 2 : index
    %c2_35 = arith.constant 2 : index
    %26 = vector.load %arg3[%c0_33, %c2_34, %c2_35] : memref<2x6x6xf32, #tpu.memory_space<vmem>>, vector<1x1x3xf32>
    %27 = vector.shape_cast %26 : vector<1x1x3xf32> to vector<1x3xf32>
    %c1_36 = arith.constant 1 : index
    %c0_37 = arith.constant 0 : index
    %c2_38 = arith.constant 2 : index
    %28 = vector.load %arg3[%c1_36, %c0_37, %c2_38] : memref<2x6x6xf32, #tpu.memory_space<vmem>>, vector<1x1x3xf32>
    %29 = vector.shape_cast %28 : vector<1x1x3xf32> to vector<1x3xf32>
    %c1_39 = arith.constant 1 : index
    %c1_40 = arith.constant 1 : index
    %c2_41 = arith.constant 2 : index
    %30 = vector.load %arg3[%c1_39, %c1_40, %c2_41] : memref<2x6x6xf32, #tpu.memory_space<vmem>>, vector<1x1x3xf32>
    %31 = vector.shape_cast %30 : vector<1x1x3xf32> to vector<1x3xf32>
    %c1_42 = arith.constant 1 : index
    %c2_43 = arith.constant 2 : index
    %c2_44 = arith.constant 2 : index
    %32 = vector.load %arg3[%c1_42, %c2_43, %c2_44] : memref<2x6x6xf32, #tpu.memory_space<vmem>>, vector<1x1x3xf32>
    %33 = vector.shape_cast %32 : vector<1x1x3xf32> to vector<1x3xf32>
    %34 = tpu.concatenate %23, %25, %27, %29, %31, %33 in 1 : vector<1x3xf32>, vector<1x3xf32>, vector<1x3xf32>, vector<1x3xf32>, vector<1x3xf32>, vector<1x3xf32> -> vector<1x18xf32>
    %35 = vector.broadcast %34 : vector<1x18xf32> to vector<4x18xf32>
    %36 = arith.mulf %4, %35 : vector<4x18xf32>
    %cst_45 = arith.constant dense<0.000000e+00> : vector<4xf32>
    %37 = vector.multi_reduction <add>, %36, %cst_45 [1] : vector<4x18xf32> to vector<4xf32>
    %38 = vector.shape_cast %37 : vector<4xf32> to vector<4x1xf32>
    %c0_46 = arith.constant 0 : index
    %c2_47 = arith.constant 2 : index
    %c0_48 = arith.constant 0 : index
    %39 = vector.load %arg3[%c0_46, %c2_47, %c0_48] : memref<2x6x6xf32, #tpu.memory_space<vmem>>, vector<1x1x3xf32>
    %40 = vector.shape_cast %39 : vector<1x1x3xf32> to vector<1x3xf32>
    %c0_49 = arith.constant 0 : index
    %c3 = arith.constant 3 : index
    %c0_50 = arith.constant 0 : index
    %41 = vector.load %arg3[%c0_49, %c3, %c0_50] : memref<2x6x6xf32, #tpu.memory_space<vmem>>, vector<1x1x3xf32>
    %42 = vector.shape_cast %41 : vector<1x1x3xf32> to vector<1x3xf32>
    %c0_51 = arith.constant 0 : index
    %c4 = arith.constant 4 : index
    %c0_52 = arith.constant 0 : index
    %43 = vector.load %arg3[%c0_51, %c4, %c0_52] : memref<2x6x6xf32, #tpu.memory_space<vmem>>, vector<1x1x3xf32>
    %44 = vector.shape_cast %43 : vector<1x1x3xf32> to vector<1x3xf32>
    %c1_53 = arith.constant 1 : index
    %c2_54 = arith.constant 2 : index
    %c0_55 = arith.constant 0 : index
    %45 = vector.load %arg3[%c1_53, %c2_54, %c0_55] : memref<2x6x6xf32, #tpu.memory_space<vmem>>, vector<1x1x3xf32>
    %46 = vector.shape_cast %45 : vector<1x1x3xf32> to vector<1x3xf32>
    %c1_56 = arith.constant 1 : index
    %c3_57 = arith.constant 3 : index
    %c0_58 = arith.constant 0 : index
    %47 = vector.load %arg3[%c1_56, %c3_57, %c0_58] : memref<2x6x6xf32, #tpu.memory_space<vmem>>, vector<1x1x3xf32>
    %48 = vector.shape_cast %47 : vector<1x1x3xf32> to vector<1x3xf32>
    %c1_59 = arith.constant 1 : index
    %c4_60 = arith.constant 4 : index
    %c0_61 = arith.constant 0 : index
    %49 = vector.load %arg3[%c1_59, %c4_60, %c0_61] : memref<2x6x6xf32, #tpu.memory_space<vmem>>, vector<1x1x3xf32>
    %50 = vector.shape_cast %49 : vector<1x1x3xf32> to vector<1x3xf32>
    %51 = tpu.concatenate %40, %42, %44, %46, %48, %50 in 1 : vector<1x3xf32>, vector<1x3xf32>, vector<1x3xf32>, vector<1x3xf32>, vector<1x3xf32>, vector<1x3xf32> -> vector<1x18xf32>
    %52 = vector.broadcast %51 : vector<1x18xf32> to vector<4x18xf32>
    %53 = arith.mulf %4, %52 : vector<4x18xf32>
    %cst_62 = arith.constant dense<0.000000e+00> : vector<4xf32>
    %54 = vector.multi_reduction <add>, %53, %cst_62 [1] : vector<4x18xf32> to vector<4xf32>
    %55 = vector.shape_cast %54 : vector<4xf32> to vector<4x1xf32>
    %c0_63 = arith.constant 0 : index
    %c2_64 = arith.constant 2 : index
    %c2_65 = arith.constant 2 : index
    %56 = vector.load %arg3[%c0_63, %c2_64, %c2_65] : memref<2x6x6xf32, #tpu.memory_space<vmem>>, vector<1x1x3xf32>
    %57 = vector.shape_cast %56 : vector<1x1x3xf32> to vector<1x3xf32>
    %c0_66 = arith.constant 0 : index
    %c3_67 = arith.constant 3 : index
    %c2_68 = arith.constant 2 : index
    %58 = vector.load %arg3[%c0_66, %c3_67, %c2_68] : memref<2x6x6xf32, #tpu.memory_space<vmem>>, vector<1x1x3xf32>
    %59 = vector.shape_cast %58 : vector<1x1x3xf32> to vector<1x3xf32>
    %c0_69 = arith.constant 0 : index
    %c4_70 = arith.constant 4 : index
    %c2_71 = arith.constant 2 : index
    %60 = vector.load %arg3[%c0_69, %c4_70, %c2_71] : memref<2x6x6xf32, #tpu.memory_space<vmem>>, vector<1x1x3xf32>
    %61 = vector.shape_cast %60 : vector<1x1x3xf32> to vector<1x3xf32>
    %c1_72 = arith.constant 1 : index
    %c2_73 = arith.constant 2 : index
    %c2_74 = arith.constant 2 : index
    %62 = vector.load %arg3[%c1_72, %c2_73, %c2_74] : memref<2x6x6xf32, #tpu.memory_space<vmem>>, vector<1x1x3xf32>
    %63 = vector.shape_cast %62 : vector<1x1x3xf32> to vector<1x3xf32>
    %c1_75 = arith.constant 1 : index
    %c3_76 = arith.constant 3 : index
    %c2_77 = arith.constant 2 : index
    %64 = vector.load %arg3[%c1_75, %c3_76, %c2_77] : memref<2x6x6xf32, #tpu.memory_space<vmem>>, vector<1x1x3xf32>
    %65 = vector.shape_cast %64 : vector<1x1x3xf32> to vector<1x3xf32>
    %c1_78 = arith.constant 1 : index
    %c4_79 = arith.constant 4 : index
    %c2_80 = arith.constant 2 : index
    %66 = vector.load %arg3[%c1_78, %c4_79, %c2_80] : memref<2x6x6xf32, #tpu.memory_space<vmem>>, vector<1x1x3xf32>
    %67 = vector.shape_cast %66 : vector<1x1x3xf32> to vector<1x3xf32>
    %68 = tpu.concatenate %57, %59, %61, %63, %65, %67 in 1 : vector<1x3xf32>, vector<1x3xf32>, vector<1x3xf32>, vector<1x3xf32>, vector<1x3xf32>, vector<1x3xf32> -> vector<1x18xf32>
    %69 = vector.broadcast %68 : vector<1x18xf32> to vector<4x18xf32>
    %70 = arith.mulf %4, %69 : vector<4x18xf32>
    %cst_81 = arith.constant dense<0.000000e+00> : vector<4xf32>
    %71 = vector.multi_reduction <add>, %70, %cst_81 [1] : vector<4x18xf32> to vector<4xf32>
    %72 = vector.shape_cast %71 : vector<4xf32> to vector<4x1xf32>
    %73 = tpu.concatenate %21, %38, %55, %72 in 1 : vector<4x1xf32>, vector<4x1xf32>, vector<4x1xf32>, vector<4x1xf32> -> vector<4x4xf32>
    %cst_82 = arith.constant dense<0.000000e+00> : vector<4xf32>
    %74 = vector.multi_reduction <add>, %73, %cst_82 [1] : vector<4x4xf32> to vector<4xf32>
    %75 = vector.shape_cast %74 : vector<4xf32> to vector<4x1xf32>
    %cst_83 = arith.constant 4.000000e+00 : f32
    %76 = vector.broadcast %cst_83 : f32 to vector<4x1xf32>
    %77 = arith.divf %75, %76 : vector<4x1xf32>
    %78 = vector.broadcast %77 : vector<4x1xf32> to vector<4x4xf32>
    %79 = arith.subf %73, %78 : vector<4x4xf32>
    %80 = arith.mulf %79, %79 : vector<4x4xf32>
    %cst_84 = arith.constant dense<0.000000e+00> : vector<4xf32>
    %81 = vector.multi_reduction <add>, %80, %cst_84 [1] : vector<4x4xf32> to vector<4xf32>
    %82 = vector.shape_cast %81 : vector<4xf32> to vector<4x1xf32>
    %cst_85 = arith.constant 4.000000e+00 : f32
    %83 = vector.broadcast %cst_85 : f32 to vector<4x1xf32>
    %84 = arith.divf %82, %83 : vector<4x1xf32>
    %cst_86 = arith.constant 9.99999974E-6 : f32
    %85 = vector.broadcast %cst_86 : f32 to vector<4x1xf32>
    %86 = arith.addf %84, %85 : vector<4x1xf32>
    %87 = math.rsqrt %86 : vector<4x1xf32>
    %88 = vector.broadcast %87 : vector<4x1xf32> to vector<4x4xf32>
    %89 = arith.mulf %79, %88 : vector<4x4xf32>
    %c0_87 = arith.constant 0 : index
    %c0_88 = arith.constant 0 : index
    %90 = vector.load %arg2[%c0_87, %c0_88] : memref<4x4xf32, #tpu.memory_space<vmem>>, vector<4x4xf32>
    tpu.vector_store %arg2[%c0_87, %c0_88], %89 {strides = array<i32>} : memref<4x4xf32, #tpu.memory_space<vmem>>, vector<4x4xf32>,
    return
  }
}

</mosaic_0001>

<bundles_post_ra>
// kernel: _net_forward_impl.1
= control target key start
LH: loop header
LB: loop body
LE: loop exit
PB: predicated region body
PF: predicated region fallthrough
CT: control target
= control target key end

     0   :  { %vm11_vm0 = vcmask 46080   ;;  %v212_v1 = vmov 0.0   ;;  %s213_s11 = smov 1   ;;  %s214_s14 = smov 126   ;;  %vm24_vm1 = vcmask 35848   ;;  %v65_v26 = vlaneseq  ;;  %s297_s0 = inlined_call_operand.vmem [shape: f32[2,4,4], index: 0, kind: input, shape index: {}]   ;;  %s298_s1 = inlined_call_operand.vmem [shape: f32[4,18], index: 1, kind: input, shape index: {}]   ;;  %s299_s2 = inlined_call_operand.vmem [shape: f32[4,4], index: 2, kind: output, shape index: {}]  }
   0x1   :  { %v14_v0 = vld [vmem:[%s297_s0] sm:$0xf]  ;;  %12 = vst.msk [vmem:[#allocation2] sm:$0x3f] %vm11_vm0, %v212_v1  ;;  %13 = vst.msk [vmem:[#allocation2 + $0x8] sm:$0x3f] %vm11_vm0, %v212_v1 }
   0x2   :  { %18 = vrot.lane.b32.xlu0 %v14_v0, %s213_s11  ;;  %v15_v2 = vld [vmem:[%s297_s0 + $0x4] sm:$0xf]  ;;  %s215_s15 = smov 9   ;;  %s216_s16 = smov 7   ;;  %vm55_vm2 = vcmask 23552   ;;  %vm57_vm3 = vcmask 48128  }
   0x3   :  { %s217_s0 = smov 3   ;;  %s218_s17 = smov 4   ;;  %v66_v29 = vshrl.u32 %v65_v26, 7  ;;  %vm59_vm4 = vcmask 72704   ;;  %vm61_vm5 = vcmask 97280   ;;  %vm63_vm6 = vcmask 121856  }
   0x4   :  { %s219_s18 = smov 6   ;;  %s220_s19 = smov 10   ;;  %v27_v45 = vld [vmem:[%s298_s1] sm:$0xf]  ;;  %vm70_vm7 = vcmask 142336   ;;  %vm173_vm8 = vcmask 7168  }
   0x5   :  { %s221_s20 = smov 12   ;;  %s222_s21 = smov 13   ;;  %v67_v36 = vsub.s32 0, %v66_v29  ;;  %vm175_vm9 = vcmask 15360   ;;  %vm178_vm10 = vcmask 27648  }
   0x6   :  { %20 = vrot.lane.b32.xlu0 %v15_v2, %s213_s11  ;;  %s223_s22 = smov 15  }
   0x8   :  { %v247_v3 = vld [vmem:[#allocation2] sm:$0x1]  ;;  %v32_v4 = vld [vmem:[#allocation2 + $0x8] sm:$0x1] }
   0x9   :  { %75 = vrot.lane.b32.xlu1 %v247_v3, %s214_s14 }
   0xa   :  { %44 = vrot.lane.b32.xlu0 %v32_v4, %s215_s15 }
   0xd   :  { %84 = vrot.lane.b32.xlu1 %v32_v4, %s216_s16 }
  0x74   :  { %v19_v5 = vpop.permute.xlu0 %18 }
  0x75   :  { %25 = vst.msk [vmem:[#allocation2 + $0x1] sm:$0xf] %vm24_vm1, %v19_v5 }
  0x78   :  { %v21_v6 = vpop.permute.xlu0 %20 }
  0x79   :  { %26 = vst.msk [vmem:[#allocation2 + $0x9] sm:$0xf] %vm24_vm1, %v21_v6 }
  0x7b   :  { %v76_v15 = vpop.permute.xlu1 %75 }
  0x7c   :  { %v29_v7 = vld [vmem:[#allocation2 + $0x1] sm:$0x1]  ;;  %v253_v8 = vld [vmem:[#allocation2 + $0x2] sm:$0x1]  ;;  %v107_v9 = vld [vmem:[#allocation2 + $0x4] sm:$0x1]  ;;  %v45_v17 = vpop.permute.xlu0 %44 }
  0x7d   :  { %78 = vrot.lane.b32.xlu0 %v29_v7, %s213_s11  ;;  %36 = vrot.lane.b32.xlu1 %v29_v7, %s217_s0  ;;  %v106_v10 = vld [vmem:[#allocation2 + $0x3] sm:$0x1] }
  0x7f   :  { %v85_v16 = vpop.permute.xlu1 %84 }
  0x80   :  { %v33_v11 = vld [vmem:[#allocation2 + $0x9] sm:$0x1]  ;;  %v34_v12 = vld [vmem:[#allocation2 + $0xa] sm:$0x1]  ;;  %v108_v13 = vld [vmem:[#allocation2 + $0xb] sm:$0x1] }
  0x81   :  { %81 = vrot.lane.b32.xlu0 %v253_v8, %s218_s17  ;;  %40 = vrot.lane.b32.xlu1 %v253_v8, %s219_s18  ;;  %v109_v14 = vld [vmem:[#allocation2 + $0xc] sm:$0x1] }
  0x85   :  { %115 = vrot.lane.b32.xlu0 %v107_v9, %s219_s18  ;;  %111 = vrot.lane.b32.xlu1 %v106_v10, %s217_s0 }
  0x89   :  { %145 = vrot.lane.b32.xlu0 %v106_v10, %s213_s11  ;;  %142 = vrot.lane.b32.xlu1 %v253_v8, %s214_s14 }
  0x8d   :  { %87 = vrot.lane.b32.xlu0 %v33_v11, %s220_s19  ;;  %48 = vrot.lane.b32.xlu1 %v33_v11, %s221_s20 }
  0x91   :  { %148 = vrot.lane.b32.xlu0 %v107_v9, %s218_s17  ;;  %118 = vrot.lane.b32.xlu1 %v34_v12, %s215_s15 }
  0x95   :  { %90 = vrot.lane.b32.xlu0 %v34_v12, %s222_s21  ;;  %52 = vrot.lane.b32.xlu1 %v34_v12, %s223_s22 }
  0x99   :  { %151 = vrot.lane.b32.xlu0 %v34_v12, %s216_s16  ;;  %122 = vrot.lane.b32.xlu1 %v108_v13, %s221_s20 }
  0x9d   :  { %154 = vrot.lane.b32.xlu0 %v108_v13, %s220_s19  ;;  %126 = vrot.lane.b32.xlu1 %v109_v14, %s223_s22 }
  0xa1   :  { %157 = vrot.lane.b32.xlu1 %v109_v14, %s222_s21 }
  0xef   :  { %v37_v18 = vpop.permute.xlu1 %36  ;;  %v79_v19 = vpop.permute.xlu0 %78 }
  0xf0   :  { %v56_v30 = vsel %vm55_vm2, %v247_v3, %v37_v18  ;;  %v93_v31 = vsel %vm55_vm2, %v76_v15, %v79_v19 }
  0xf3   :  { %v41_v20 = vpop.permute.xlu1 %40  ;;  %v82_v21 = vpop.permute.xlu0 %81 }
  0xf4   :  { %v58_v32 = vsel %vm57_vm3, %v56_v30, %v41_v20  ;;  %v94_v33 = vsel %vm57_vm3, %v93_v31, %v82_v21 }
  0xf5   :  { %v60_v37 = vsel %vm59_vm4, %v58_v32, %v45_v17  ;;  %v95_v38 = vsel %vm59_vm4, %v94_v33, %v85_v16 }
  0xf7   :  { %v112_v22 = vpop.permute.xlu1 %111  ;;  %v116_v23 = vpop.permute.xlu0 %115 }
  0xf8   :  { %v129_v48 = vsel %vm55_vm2, %v253_v8, %v112_v22 }
  0xf9   :  { %v130_v53 = vsel %vm57_vm3, %v129_v48, %v116_v23 }
  0xfb   :  { %v143_v24 = vpop.permute.xlu1 %142  ;;  %v146_v25 = vpop.permute.xlu0 %145 }
  0xfc   :  { %v160_v59 = vsel %vm55_vm2, %v143_v24, %v146_v25 }
  0xff   :  { %v49_v27 = vpop.permute.xlu1 %48  ;;  %v88_v28 = vpop.permute.xlu0 %87 }
 0x100   :  { %v62_v39 = vsel %vm61_vm5, %v60_v37, %v49_v27  ;;  %v96_v40 = vsel %vm61_vm5, %v95_v38, %v88_v28 }
 0x103   :  { %v119_v34 = vpop.permute.xlu1 %118  ;;  %v149_v35 = vpop.permute.xlu0 %148 }
 0x104   :  { %v131_v56 = vsel %vm59_vm4, %v130_v53, %v119_v34  ;;  %v161_v62 = vsel %vm57_vm3, %v160_v59, %v149_v35 }
 0x107   :  { %v53_v41 = vpop.permute.xlu1 %52  ;;  %v91_v42 = vpop.permute.xlu0 %90 }
 0x108   :  { %v64_v43 = vsel %vm63_vm6, %v62_v39, %v53_v41  ;;  %v97_v44 = vsel %vm63_vm6, %v96_v40, %v91_v42 }
 0x109   :  { %v68_v46 = vrot.slane %v64_v43, %v67_v36  ;;  %v101_v47 = vrot.slane %v97_v44, %v67_v36 }
 0x10b   :  { %v123_v49 = vpop.permute.xlu1 %122  ;;  %v152_v50 = vpop.permute.xlu0 %151  ;;  %v69_v51 = vmul.f32 %v68_v46, %v27_v45  ;;  %v102_v52 = vmul.f32 %v101_v47, %v27_v45 }
 0x10c   :  { %v132_v57 = vsel %vm61_vm5, %v131_v56, %v123_v49  ;;  %v162_v0 = vsel %vm59_vm4, %v161_v62, %v152_v50 }
 0x10d   :  { %v71_v54 = vsel %vm70_vm7, %v69_v51, 0.0  ;;  %v103_v55 = vsel %vm70_vm7, %v102_v52, 0.0 }
 0x10e   :  { %72 = vadd.xlane.f32.xlu0 %v71_v54  ;;  %104 = vadd.xlane.f32.xlu1 %v103_v55 }
 0x10f   :  { %v127_v58 = vpop.permute.xlu1 %126  ;;  %v155_v61 = vpop.permute.xlu0 %154 }
 0x110   :  { %v133_v60 = vsel %vm63_vm6, %v132_v57, %v127_v58  ;;  %v163_v1 = vsel %vm61_vm5, %v162_v0, %v155_v61 }
 0x111   :  { %v137_v63 = vrot.slane %v133_v60, %v67_v36 }
 0x113   :  { %v158_v2 = vpop.permute.xlu1 %157  ;;  %v138_v3 = vmul.f32 %v137_v63, %v27_v45 }
 0x114   :  { %v164_v4 = vsel %vm63_vm6, %v163_v1, %v158_v2 }
 0x115   :  { %v168_v5 = vrot.slane %v164_v4, %v67_v36  ;;  %v139_v6 = vsel %vm70_vm7, %v138_v3, 0.0 }
 0x116   :  { %140 = vadd.xlane.f32.xlu0 %v139_v6 }
 0x117   :  { %v169_v7 = vmul.f32 %v168_v5, %v27_v45 }
 0x119   :  { %v170_v8 = vsel %vm70_vm7, %v169_v7, 0.0 }
 0x11a   :  { %171 = vadd.xlane.f32.xlu0 %v170_v8 }
 0x19b   :  { %v73_v9 = vpop.xlane.xlu0 %72  ;;  %v105_v10 = vpop.xlane.xlu1 %104 }
 0x19c   :  { %v174_v12 = vsel %vm173_vm8, %v73_v9, %v105_v10 }
 0x1a3   :  { %v141_v11 = vpop.xlane.xlu0 %140 }
 0x1a4   :  { %v176_v13 = vsel %vm175_vm9, %v174_v12, %v141_v11 }
 0x1a7   :  { %v172_v14 = vpop.xlane.xlu0 %171 }
 0x1a8   :  { %v177_v15 = vsel %vm55_vm2, %v176_v13, %v172_v14 }
 0x1a9   :  { %v179_v16 = vsel %vm178_vm10, %v177_v15, 0.0 }
 0x1aa   :  { %180 = vadd.xlane.f32.xlu1 %v179_v16 }
 0x237   :  { %v181_v17 = vpop.xlane.xlu1 %180 }
 0x238   :  { %v183_v18 = vmul.f32 0.25, %v181_v17 }
 0x23a   :  { %v184_v19 = vsub.f32 %v177_v15, %v183_v18 }
 0x23c   :  { %v185_v20 = vmul.f32 %v184_v19, %v184_v19 }
 0x23e   :  { %v186_v21 = vsel %vm178_vm10, %v185_v20, 0.0 }
 0x23f   :  { %187 = vadd.xlane.f32.xlu0 %v186_v21 }
 0x2cc   :  { %v188_v22 = vpop.xlane.xlu0 %187 }
 0x2cd   :  { %v189_v23 = vmul.f32 0.25, %v188_v22 }
 0x2cf   :  { %v190_v24 = vadd.f32 1e-05, %v189_v23 }
 0x2d1   :  { %210 = vrsqrt.f32 %v190_v24 }
 0x2db   :  { %v211_v25 = vpop.eup %210 }
 0x2dc   :  { %v192_v26 = vmul.f32 %v211_v25, %v184_v19 }
 0x2de   :  { %193 = vst.msk [vmem:[%s299_s2] sm:$0xf] %vm178_vm10, %v192_v26 }

</bundles_post_ra>
